<compile_context>
chip_gen: v6e
topology: v6e:2x2x1
jax: 0.10.0
libtpu: 0.0.40
codegen_flags: <defaults>
</compile_context>

<pallas_src>
import functools

import jax
import jax.numpy as jnp
from jax.experimental import pallas as pl
from jax.experimental.pallas import tpu as pltpu


# --------------------------------------------------------------------------- #
# Exponent helpers (static p, traced x)                                        #
# --------------------------------------------------------------------------- #
def _pow_int(x, n):
    """x ** n for a static positive Python int n via square-and-multiply (VALU only)."""
    assert n >= 1
    result = None
    base = x
    while n > 0:
        if n & 1:
            result = base if result is None else result * base
        n >>= 1
        if n:
            base = base * base
    return result


def _pow_p(x, p):
    """x ** p for static p > 0 (x already clamped to be positive)."""
    p = float(p)
    if p.is_integer() and 1.0 <= p <= 16.0:
        return _pow_int(x, int(p))                     # pure VALU (p=3 -> 2 muls/elem)
    if (2.0 * p).is_integer() and 0.5 <= p <= 16.0:
        k = int(p)                                     # half-integer: x**k * sqrt(x)
        s = jnp.sqrt(x)                                # single EUP op / element
        return s if k == 0 else _pow_int(x, k) * s
    return jnp.power(x, p)                             # general float p (exp+log on EUP)


# --------------------------------------------------------------------------- #
# Kernels                                                                      #
# --------------------------------------------------------------------------- #
def _gem_kernel(x_ref, o_ref, *, p, eps, inv_hw):
    # Full spatial plane per tile: one pass, reduce along lanes.
    x = jnp.maximum(x_ref[...].astype(jnp.float32), eps)          # clamp(min=eps)
    mean = jnp.sum(_pow_p(x, p), axis=-1, keepdims=True) * inv_hw  # adaptive_avg_pool2d -> 1x1
    # Final root is only (block_nc, 1) elements — jnp.power cost is negligible.
    o_ref[...] = jnp.power(mean, 1.0 / p).astype(o_ref.dtype)


def _gem_kernel_hw_split(x_ref, o_ref, acc_ref, *, p, eps, inv_hw, hw, block_hw, mask_tail):
    # Large spatial plane: accumulate partial sums over an "arbitrary" HW axis.
    j = pl.program_id(1)

    @pl.when(j == 0)
    def _():
        acc_ref[...] = jnp.zeros_like(acc_ref)

    x = jnp.maximum(x_ref[...].astype(jnp.float32), eps)
    xp = _pow_p(x, p)
    if mask_tail:
        # HW is not a multiple of block_hw: zero the out-of-range tail columns.
        col = j * block_hw + jax.lax.broadcasted_iota(jnp.int32, xp.shape, 1)
        xp = jnp.where(col < hw, xp, 0.0)
    acc_ref[...] += jnp.sum(xp, axis=-1, keepdims=True)

    @pl.when(j == pl.num_programs(1) - 1)
    def _():
        mean = acc_ref[...] * inv_hw
        o_ref[...] = jnp.power(mean, 1.0 / p).astype(o_ref.dtype)


# --------------------------------------------------------------------------- #
# Tiling policy                                                                #
# --------------------------------------------------------------------------- #
def _vmem_capacity_bytes():
    try:
        cap = int(getattr(pltpu.get_tpu_info(), "vmem_capacity_bytes", 0) or 0)
        if cap > 0:
            return cap
    except Exception:
        pass
    return 64 << 20  # conservative default (v7x per-TensorCore VMEM)


def _input_spec(block_shape, index_map, n_bufs):
    """Input BlockSpec, with deep (>2) pipelining when requested and supported."""
    if n_bufs != 2 and hasattr(pl, "Buffered"):
        try:
            return pl.BlockSpec(block_shape, index_map, pipeline_mode=pl.Buffered(n_bufs))
        except TypeError:
            pass  # older JAX without pipeline_mode: default double-buffering
    return pl.BlockSpec(block_shape, index_map)


def _choose_tiles(nc, hw, itemsize, vmem_cap, sub, n_bufs):
    """Pick (block_nc, block_hw).  block_hw == hw means full spatial plane per tile."""
    cap_rows = max(sub, (nc // sub) * sub)       # largest sub-aligned row block <= array
    row_bytes = hw * itemsize
    # Generation-aware targets: v7x has 64 MiB VMEM / 3.2 TB/s HBM; v5e/v6e 128 MiB.
    per_buf_target = max(8 << 20, min(vmem_cap // 8, 16 << 20))  # bytes / input buffer
    pipe_budget = (vmem_cap * 11) // 20                          # ~55% of VMEM for buffers

    def ensure_two_steps(rows):
        # Guarantee >= 2 grid steps over NC whenever possible, so the "parallel"
        # axis can shard across both TensorCores on v7x megacore parts.
        if rows * 2 > nc and cap_rows >= 2 * sub:
            rows = max(sub, min(cap_rows, pl.cdiv(pl.cdiv(nc, 2), sub) * sub))
        return rows

    # Per-row VMEM cost of a full-HW tile across all resident pipeline buffers:
    # n_bufs input copies + 2 output buffers of one lane-padded (1 -> 128) row.
    row_cost = n_bufs * row_bytes + 2 * 128 * itemsize
    rows = min(pipe_budget // max(row_cost, 1), per_buf_target // max(row_bytes, 1))
    if rows >= sub:
        rows = max(sub, min((rows // sub) * sub, cap_rows))
        return ensure_two_steps(rows), hw

    # Huge spatial plane: also tile the HW (reduction) axis.
    rows = ensure_two_steps(min(cap_rows, 128))
    block_hw = (per_buf_target // (rows * itemsize)) // 128 * 128
    block_hw = max(128, min(block_hw, pl.cdiv(hw, 128) * 128))
    return rows, block_hw


# --------------------------------------------------------------------------- #
# Public wrapper                                                               #
# --------------------------------------------------------------------------- #
def gem_pool(x, p=3.0, eps=1e-6, block_nc=None, block_hw=None):
    """GeneralizedMeanPooling with output_size=1.  x: (N, C, H, W) -> (N, C, 1, 1)."""
    n, c, h, w = x.shape
    nc, hw = n * c, h * w
    x2d = x.reshape(nc, hw)

    itemsize = jnp.dtype(x.dtype).itemsize
    sub = max(8, 32 // itemsize)                 # dtype-native sublane tile (8/16/32)

    # Tiny NC: pad rows to one sublane tile so block <= array always holds.
    nc_work = nc
    if nc < sub:
        x2d = jnp.pad(x2d, ((0, sub - nc), (0, 0)))
        nc_work = sub

    vmem_cap = _vmem_capacity_bytes()
    if block_nc is None or block_hw is None:
        auto_nc, auto_hw = _choose_tiles(nc_work, hw, itemsize, vmem_cap, sub, 3)
        if block_nc is None:
            block_nc = auto_nc
        if block_hw is None:
            block_hw = auto_hw

    full_hw = (block_hw == hw)
    grid_nc = pl.cdiv(nc_work, block_nc)
    grid_hw = 1 if full_hw else pl.cdiv(hw, block_hw)
    total_steps = grid_nc * grid_hw
    n_bufs = 3 if total_steps >= 3 else 2        # deep pipelining only if it can help

    p = float(p)
    eps = float(eps)
    inv_hw = 1.0 / float(hw)

    # VMEM budget: pipelined input buffers + lane-padded output buffers + scratch.
    in_tile = block_nc * block_hw * itemsize
    out_tile = block_nc * 128 * itemsize         # (block_nc, 1) tile pads to 128 lanes
    acc_tile = 0 if full_hw else block_nc * 128 * 4
    needed = n_bufs * in_tile + 2 * out_tile + acc_tile + (4 << 20)
    vmem_limit = int(min(max(needed, 16 << 20), (vmem_cap * 3) // 4))

    def _call(bufs):
        if full_hw:
            grid = (grid_nc,)
            in_specs = [_input_spec((block_nc, hw), lambda i: (i, 0), bufs)]
            out_specs = pl.BlockSpec((block_nc, 1), lambda i: (i, 0))
            scratch_shapes = []
            dim_sem = ("parallel",)
            kern = functools.partial(_gem_kernel, p=p, eps=eps, inv_hw=inv_hw)
        else:
            grid = (grid_nc, grid_hw)
            in_specs = [_input_spec((block_nc, block_hw), lambda i, j: (i, j), bufs)]
            out_specs = pl.BlockSpec((block_nc, 1), lambda i, j: (i, 0))
            scratch_shapes = [pltpu.VMEM((block_nc, 1), jnp.float32)]
            dim_sem = ("parallel", "arbitrary")
            kern = functools.partial(
                _gem_kernel_hw_split, p=p, eps=eps, inv_hw=inv_hw,
                hw=hw, block_hw=block_hw, mask_tail=(hw % block_hw != 0))
        return pl.pallas_call(
            kern,
            out_shape=jax.ShapeDtypeStruct((nc_work, 1), x.dtype),
            grid_spec=pltpu.PrefetchScalarGridSpec(
                num_scalar_prefetch=0,
                grid=grid,
                in_specs=in_specs,
                out_specs=out_specs,
                scratch_shapes=scratch_shapes,
            ),
            compiler_params=pltpu.CompilerParams(
                dimension_semantics=dim_sem,
                vmem_limit_bytes=vmem_limit,
            ),
        )(x2d)

    try:
        out2d = _call(n_bufs)
    except Exception:
        if n_bufs == 2:
            raise
        # Deep pipelining (pl.Buffered) unsupported in this JAX build: fall back
        # to the default double-buffered pipeline.
        out2d = _call(2)

    return out2d[:nc].reshape(n, c, 1, 1)


def gem_reference(x, p=3.0, eps=1e-6):
    xc = jnp.maximum(x.astype(jnp.float32), eps)
    m = jnp.mean(jnp.power(xc, p), axis=(2, 3), keepdims=True)
    return jnp.power(m, 1.0 / p).astype(x.dtype)


if __name__ == "__main__":
    key = jax.random.PRNGKey(0)
    k1, k2, k3, k4 = jax.random.split(key, 4)

    def check(x, p, **kw):
        y = jax.block_until_ready(gem_pool(x, p=p, **kw))
        y_ref = gem_reference(x, p=p)
        assert y.shape == (x.shape[0], x.shape[1], 1, 1)
        assert jnp.allclose(y.astype(jnp.float32), y_ref.astype(jnp.float32),
                            atol=1e-5, rtol=1e-5), f"mismatch p={p} shape={x.shape}"

    # 1) Canonical small NCHW feature map (HW = 256), p = 3 (standard GeM).
    check(jax.random.normal(k1, (2, 4, 16, 16), jnp.float32), 3.0)
    # 2) HW = 49 (7x7): spatial size not a multiple of the 128-lane tile.
    check(jax.random.normal(k2, (2, 4, 7, 7), jnp.float32), 3.0)
    # 3) Half-integer exponent path (x*x*sqrt(x) instead of exp/log pow).
    check(jax.random.normal(k3, (2, 4, 16, 16), jnp.float32), 2.5)
    # 4) Multi-step "parallel" NC grid + 3-deep input pipelining.
    check(jax.random.normal(k4, (2, 128, 16, 16), jnp.float32), 3.0, block_nc=8)
    # 5) HW-split accumulator path with a masked tail block (320 % 128 != 0).
    check(jax.random.normal(k1, (2, 4, 16, 20), jnp.float32), 3.0,
          block_nc=8, block_hw=128)

    print("KERNEL_OK")
</pallas_src>

<mosaic_0001>
module attributes {stable_mosaic.version = 11 : i64} {
  func.func @_gem_kernel(%arg0: i32, %arg1: memref<8x256xf32, #tpu.memory_space<vmem>>, %arg2: memref<8x1xf32, #tpu.memory_space<vmem>>) attributes {dimension_semantics = [#tpu.dimension_semantics<parallel>], iteration_bounds = array<i64: 1>, scalar_prefetch = 0 : i64, scratch_operands = 0 : i64, tpu.core_type = #tpu.core_type<tc>, window_params = [{transform_indices = @transform_0, window_bounds = array<i64: 8, 256>}, {transform_indices = @transform_1, window_bounds = array<i64: 8, 1>}]} {
    %c0 = arith.constant 0 : index
    %c0_0 = arith.constant 0 : index
    %0 = vector.load %arg1[%c0, %c0_0] : memref<8x256xf32, #tpu.memory_space<vmem>>, vector<8x256xf32>
    %cst = arith.constant 9.99999997E-7 : f32
    %1 = vector.broadcast %cst : f32 to vector<8x256xf32>
    %2 = arith.maximumf %0, %1 : vector<8x256xf32>
    %3 = arith.mulf %2, %2 : vector<8x256xf32>
    %4 = arith.mulf %2, %3 : vector<8x256xf32>
    %cst_1 = arith.constant dense<0.000000e+00> : vector<8xf32>
    %5 = vector.multi_reduction <add>, %4, %cst_1 [1] : vector<8x256xf32> to vector<8xf32>
    %6 = vector.shape_cast %5 : vector<8xf32> to vector<8x1xf32>
    %cst_2 = arith.constant 3.906250e-03 : f32
    %7 = vector.broadcast %cst_2 : f32 to vector<8x1xf32>
    %8 = arith.mulf %6, %7 : vector<8x1xf32>
    %cst_3 = arith.constant 0.333333343 : f32
    %9 = vector.broadcast %cst_3 : f32 to vector<8x1xf32>
    %10 = math.powf %8, %9 : vector<8x1xf32>
    %c0_4 = arith.constant 0 : index
    %c0_5 = arith.constant 0 : index
    %11 = vector.load %arg2[%c0_4, %c0_5] : memref<8x1xf32, #tpu.memory_space<vmem>>, vector<8x1xf32>
    tpu.vector_store %arg2[%c0_4, %c0_5], %10 {strides = array<i32>} : memref<8x1xf32, #tpu.memory_space<vmem>>, vector<8x1xf32>,
    return
  }
  func.func @transform_0(%arg0: i32) -> (i32, i32) {
    %c0_i32 = arith.constant 0 : i32
    %c0_i32_0 = arith.constant 0 : i32
    return %arg0, %c0_i32 : i32, i32
  }
  func.func @transform_1(%arg0: i32) -> (i32, i32) {
    %c0_i32 = arith.constant 0 : i32
    %c0_i32_0 = arith.constant 0 : i32
    return %arg0, %c0_i32 : i32, i32
  }
}

</mosaic_0001>

<bundles_post_ra>
// kernel: tpu_custom_call.1
= control target key start
LH: loop header
LB: loop body
LE: loop exit
PB: predicated region body
PF: predicated region fallthrough
CT: control target
= control target key end

     0   :  { %6 = vsyncpa [#allocation3], 0  ;;  %s85_s6 = smov [#allocation2]   ;;  %s102_s0 = inlined_call_operand.hbm [shape: f32[8,256], index: 0, kind: input, shape index: {}]   ;;  %s103_s1 = inlined_call_operand.vmem [shape: f32[8,1], index: 1, kind: output, shape index: {}]  }
   0x1   :  { %s13_s7 = sshll.u32 %s85_s6, 4  ;;  %s14_s7 = int_to_ptr.vmem [resolvable:$true] %s13_s7 }
   0x2   :  { %s71_s8 = scalar_lea.vmem %s14_s7, 256  ;;  %p76_p1 = scmp.lt.s32.totalorder %s14_s7, %s14_s7 }
   0x3   :  { %p72_p0 = scmp.ne.s32.totalorder %s14_s7, %s71_s8  ;;  %p77_p2 = scmp.lt.s32.totalorder %s71_s8, %s71_s8 }
   0x5   :  { %p78_p3 = por %p77_p2, %p76_p1 }
   0x7   :  { %p79_p4 = pnand %p78_p3, %p72_p0 }
   0x9   :  { %82 = shalt.err (!%p79_p4)
}
   0xa   :  { %16 = dma.hbm_to_vmem [thread:$0]  %s102_s0, 256, %s14_s7, [#allocation3]  }
   0xb   :  { %83 = dma.done.wait [#allocation3], 256  }
   0xc   :  { %84 = vsyncadd [#allocation3], 4294967040  ;;  %v20_v0 = vld [vmem:[#allocation2] sm:$0xff]  ;;  %v21_v1 = vld [vmem:[#allocation2 + $0x8] sm:$0xff]  ;;  %vm33_vm4 = vcmask 7168  }
   0xd   :  { %v22_v2 = vmax.f32 %v20_v0, 1e-06  ;;  %v23_v3 = vmax.f32 %v21_v1, 1e-06 }
   0xf   :  { %v24_v4 = vmul.f32 %v22_v2, %v22_v2  ;;  %v25_v5 = vmul.f32 %v23_v3, %v23_v3 }
  0x11   :  { %v26_v6 = vmul.f32 %v24_v4, %v22_v2  ;;  %v27_v7 = vmul.f32 %v25_v5, %v23_v3 }
  0x13   :  { %v28_v8 = vadd.f32 %v27_v7, %v26_v6 }
  0x15   :  { %29 = vadd.xlane.f32.xlu0 %v28_v8 }
  0x9e   :  { %v30_v9 = vpop.xlane.xlu0 %29 }
  0x9f   :  { %v31_v10 = vmul.f32 0.00390625, %v30_v9 }
  0xa1   :  { %v42_v11 = vand.u32 2147483647, %v31_v10  ;;  %v46_v14 = vand.u32 2147483648, %v31_v10  ;;  %vm41_vm2 = vcmp.lt.f32.partialorder %v31_v10, 0.0  ;;  %vm40_vm3 = vcmp.eq.f32.partialorder %v31_v10, 0.0 }
  0xa3   :  { %59 = vlog2.f32 %v42_v11  ;;  %vm50_vm0 = vweird.f32 %v42_v11  ;;  %vm52_vm1 = vcmp.eq.f32.partialorder %v42_v11, 0.0  ;;  %vm43_vm5 = vcmp.eq.f32.partialorder %v42_v11, inf }
  0xb0   :  { %v60_v12 = vpop.eup %59 }
  0xb1   :  { %v47_v13 = vmul.f32 0.33333334, %v60_v12 }
  0xb3   :  { %61 = vpow2.f32 %v47_v13 }
  0xc0   :  { %v62_v15 = vpop.eup %61 }
  0xc1   :  { %v49_v16 = vor.u32 %v62_v15, %v46_v14 }
  0xc3   :  { %v51_v17 = vsel %vm50_vm0, %v31_v10, %v49_v16 }
  0xc4   :  { %v54_v18 = vsel %vm52_vm1, %v46_v14, %v51_v17 }
  0xc5   :  { %v55_v19 = vsel %vm41_vm2, nan, %v54_v18 }
  0xc6   :  { %v56_v20 = vsel %vm40_vm3, 0.0, %v55_v19 }
  0xc7   :  { %v57_v21 = vsel %vm43_vm5, inf, %v56_v20 }
  0xc8   :  { %34 = vst.msk [vmem:[%s103_s1] sm:$0xff] %vm33_vm4, %v57_v21 }
  0xc9   :  { %39 = vsyncpa [#allocation3], 1 }

</bundles_post_ra>
